<compile_context>
chip_gen: v7x
topology: tpu7x:2x2x1
jax: 0.10.0
libtpu: 0.0.40
codegen_flags: <defaults>
</compile_context>

<pallas_src>
import functools
import math

import jax
import jax.numpy as jnp
import numpy as np
from jax.experimental import pallas as pl
from jax.experimental.pallas import tpu as pltpu


# ----------------------------------------------------------------------------
# Kernel 1: fused QKV projection (scale folded into Q), heads-major output.
# ----------------------------------------------------------------------------
def _qkv_proj_kernel(x_ref, wq_ref, wk_ref, wv_ref, q_ref, k_ref, v_ref, *,
                     heads, scale):
    # x_ref: (1, TS, E) bf16; w*_ref: (E, E) bf16 in (in, out) layout
    # q/k/v_ref: (1, H, TS, S) bf16
    x = x_ref[0]                                   # (TS, E)
    ts, e = x.shape
    s = e // heads

    def project(w_ref, out_ref, scl):
        y = jnp.dot(x, w_ref[...], preferred_element_type=jnp.float32)  # (TS, E) f32
        if scl is not None:
            y = y * scl
        y3 = y.reshape(ts, heads, s)               # (TS, H, S)
        out_ref[0] = jnp.transpose(y3, (1, 0, 2)).astype(out_ref.dtype)  # (H, TS, S)

    project(wq_ref, q_ref, scale)                  # scale folded into Q
    project(wk_ref, k_ref, None)
    project(wv_ref, v_ref, None)


# ----------------------------------------------------------------------------
# Kernel 2: flash attention (online softmax) + unifyheads projection.
# ----------------------------------------------------------------------------
def _flash_attn_kernel(q_ref, k_ref, v_ref, wo_ref, bo_ref, o_ref,
                       acc_ref, m_ref, l_ref, *, causal, tq, tk):
    # q_ref: (1, H, TQ, S) bf16 (pre-scaled); k/v_ref: (1, H, TK, S) bf16
    # wo_ref: (E, E) bf16 (in, out); bo_ref: (1, E) f32; o_ref: (1, TQ, E) f32
    # acc_ref: (H, TQ, S) f32; m_ref/l_ref: (H, TQ, 1) f32
    qi = pl.program_id(1)
    ki = pl.program_id(2)

    @pl.when(ki == 0)
    def _():
        m_ref[...] = jnp.full_like(m_ref, -jnp.inf)
        l_ref[...] = jnp.zeros_like(l_ref)
        acc_ref[...] = jnp.zeros_like(acc_ref)

    def attend():
        q = q_ref[0]                               # (H, TQ, S)
        k = k_ref[0]                               # (H, TK, S)
        v = v_ref[0]                               # (H, TK, S)

        scores = jnp.einsum('hqd,hkd->hqk', q, k,
                            preferred_element_type=jnp.float32)   # (H, TQ, TK)
        if causal:
            # Mask built once per grid step (not per head).
            q_idx = qi * tq + jax.lax.broadcasted_iota(jnp.int32, (tq, tk), 0)
            k_idx = ki * tk + jax.lax.broadcasted_iota(jnp.int32, (tq, tk), 1)
            scores = jnp.where((k_idx > q_idx)[None, :, :], -jnp.inf, scores)

        m_prev = m_ref[...]                                        # (H, TQ, 1)
        m_new = jnp.maximum(m_prev, jnp.max(scores, axis=-1, keepdims=True))
        alpha = jnp.exp(m_prev - m_new)
        p = jnp.exp(scores - m_new)                                # (H, TQ, TK)
        l_ref[...] = alpha * l_ref[...] + jnp.sum(p, axis=-1, keepdims=True)
        acc_ref[...] = alpha * acc_ref[...] + jnp.einsum(
            'hqk,hkd->hqd', p.astype(v.dtype), v,
            preferred_element_type=jnp.float32)                    # (H, TQ, S)
        m_ref[...] = m_new

    if causal:
        # Skip KV tiles entirely above the diagonal (~50% of attention FLOPs).
        @pl.when(ki * tk <= qi * tq + (tq - 1))
        def _():
            attend()
    else:
        attend()

    @pl.when(ki == pl.num_programs(2) - 1)
    def _():
        heads, _, s = acc_ref.shape
        inv_l = pl.reciprocal(l_ref[...], approx=True)             # (H, TQ, 1)
        ctx = acc_ref[...] * inv_l                                 # (H, TQ, S)
        ctx = jnp.transpose(ctx, (1, 0, 2)).reshape(tq, heads * s)  # (TQ, E)
        y = jnp.dot(ctx.astype(wo_ref.dtype), wo_ref[...],
                    preferred_element_type=jnp.float32) + bo_ref[...]
        o_ref[0] = y.astype(o_ref.dtype)                           # lane-dense store


# ----------------------------------------------------------------------------
# Wrapper
# ----------------------------------------------------------------------------
def _choose_tile(t, preferred):
    for cand in [preferred] + [c for c in (512, 256, 128, 64, 32, 16, 8)
                               if c < preferred]:
        if cand <= t and t % cand == 0:
            return cand
    return t


def self_attention(x, wq, wk, wv, wo, bo, *, heads, scalefactor=None, mask=False):
    """x: (B, T, E) f32. w*: (E, E) PyTorch layout (out, in). bo: (E,)."""
    b, t, e = x.shape
    assert e % heads == 0
    s = e // heads
    scale = (1.0 / math.sqrt(s)) if scalefactor is None else scalefactor

    # Glue: pre-transpose Linear weights to (in, out), cast to bf16, 2-D-ify bias.
    x_bf = x.astype(jnp.bfloat16)
    wq_t = wq.T.astype(jnp.bfloat16)
    wk_t = wk.T.astype(jnp.bfloat16)
    wv_t = wv.T.astype(jnp.bfloat16)
    wo_t = wo.T.astype(jnp.bfloat16)
    bo2 = bo.reshape(1, e).astype(jnp.float32)

    ts = _choose_tile(t, 256)   # projection sequence tile
    tq = _choose_tile(t, 256)   # query tile (sized for v7x 64 MiB / v6e MXU)
    tk = _choose_tile(t, 512)   # key/value tile

    # --- Kernel 1: QKV projection, heads-major (B, H, T, S) bf16 outputs ---
    proj = pl.pallas_call(
        functools.partial(_qkv_proj_kernel, heads=heads, scale=scale),
        out_shape=[jax.ShapeDtypeStruct((b, heads, t, s), jnp.bfloat16)] * 3,
        grid_spec=pltpu.PrefetchScalarGridSpec(
            num_scalar_prefetch=0,
            grid=(b, t // ts),
            in_specs=[
                pl.BlockSpec((1, ts, e), lambda bi, ti: (bi, ti, 0)),
                pl.BlockSpec((e, e), lambda bi, ti: (0, 0)),
                pl.BlockSpec((e, e), lambda bi, ti: (0, 0)),
                pl.BlockSpec((e, e), lambda bi, ti: (0, 0)),
            ],
            out_specs=[pl.BlockSpec((1, heads, ts, s),
                                    lambda bi, ti: (bi, 0, ti, 0))] * 3,
        ),
        compiler_params=pltpu.CompilerParams(
            dimension_semantics=("parallel", "parallel")),
    )
    q, k, v = proj(x_bf, wq_t, wk_t, wv_t)

    # --- Kernel 2: flash attention + unifyheads ---
    attn = pl.pallas_call(
        functools.partial(_flash_attn_kernel, causal=mask, tq=tq, tk=tk),
        out_shape=jax.ShapeDtypeStruct((b, t, e), jnp.float32),
        grid_spec=pltpu.PrefetchScalarGridSpec(
            num_scalar_prefetch=0,
            grid=(b, t // tq, t // tk),
            in_specs=[
                pl.BlockSpec((1, heads, tq, s), lambda bi, qi, ki: (bi, 0, qi, 0)),
                pl.BlockSpec((1, heads, tk, s), lambda bi, qi, ki: (bi, 0, ki, 0)),
                pl.BlockSpec((1, heads, tk, s), lambda bi, qi, ki: (bi, 0, ki, 0)),
                pl.BlockSpec((e, e), lambda bi, qi, ki: (0, 0)),
                pl.BlockSpec((1, e), lambda bi, qi, ki: (0, 0)),
            ],
            out_specs=pl.BlockSpec((1, tq, e), lambda bi, qi, ki: (bi, qi, 0)),
            scratch_shapes=[
                pltpu.VMEM((heads, tq, s), jnp.float32),   # accumulator
                pltpu.VMEM((heads, tq, 1), jnp.float32),   # running max m
                pltpu.VMEM((heads, tq, 1), jnp.float32),   # running sum l
            ],
        ),
        compiler_params=pltpu.CompilerParams(
            dimension_semantics=("parallel", "parallel", "arbitrary")),
    )
    return attn(q, k, v, wo_t, bo2)


# ----------------------------------------------------------------------------
# Pure-JAX reference (mirror of the PyTorch forward; kqnorm=False).
# ----------------------------------------------------------------------------
def _reference(x, wq, wk, wv, wo, bo, heads, scalefactor=None, mask=False):
    b, t, e = x.shape
    s = e // heads
    scale = (1.0 / math.sqrt(s)) if scalefactor is None else scalefactor
    q = (x @ wq.T).reshape(b, t, heads, s).transpose(0, 2, 1, 3)
    k = (x @ wk.T).reshape(b, t, heads, s).transpose(0, 2, 1, 3)
    v = (x @ wv.T).reshape(b, t, heads, s).transpose(0, 2, 1, 3)
    dot = jnp.einsum('bhqs,bhks->bhqk', q, k) * scale
    if mask:
        dot = jnp.where(jnp.triu(jnp.ones((t, t), bool), 1), -jnp.inf, dot)
    p = jax.nn.softmax(dot, axis=-1)
    o = jnp.einsum('bhqk,bhks->bhqs', p, v)
    o = o.transpose(0, 2, 1, 3).reshape(b, t, e)
    return o @ wo.T + bo


if __name__ == "__main__":
    b, t, emb, heads = 2, 8, 32, 4   # small shapes; s = emb // heads = 8

    key = jax.random.PRNGKey(0)
    kx, k1, k2, k3, k4, k5 = jax.random.split(key, 6)
    x = jax.random.normal(kx, (b, t, emb), dtype=jnp.float32)
    # Deterministic parameter init (PyTorch Linear weight layout: (out, in)).
    wq = jax.random.normal(k1, (emb, emb), dtype=jnp.float32) * 0.1
    wk = jax.random.normal(k2, (emb, emb), dtype=jnp.float32) * 0.1
    wv = jax.random.normal(k3, (emb, emb), dtype=jnp.float32) * 0.1
    wo = jax.random.normal(k4, (emb, emb), dtype=jnp.float32) * 0.1
    bo = jax.random.normal(k5, (emb,), dtype=jnp.float32) * 0.1

    # Reference uses the same bf16-quantized operands the kernel consumes.
    def q16(a):
        return a.astype(jnp.bfloat16).astype(jnp.float32)

    ok = True
    for causal in (False, True):
        out = self_attention(x, wq, wk, wv, wo, bo, heads=heads, mask=causal)
        out = jax.block_until_ready(out)
        ref = _reference(q16(x), q16(wq), q16(wk), q16(wv), q16(wo), bo,
                         heads=heads, mask=causal)
        np.testing.assert_allclose(np.asarray(out), np.asarray(ref),
                                   rtol=2e-2, atol=2e-2)

    if ok:
        print("KERNEL_OK")
</pallas_src>

<mosaic_0001>
module attributes {stable_mosaic.version = 11 : i64} {
  func.func @_qkv_proj_kernel(%arg0: i32, %arg1: i32, %arg2: memref<1x8x32xbf16, #tpu.memory_space<vmem>>, %arg3: memref<32x32xbf16, #tpu.memory_space<vmem>>, %arg4: memref<32x32xbf16, #tpu.memory_space<vmem>>, %arg5: memref<32x32xbf16, #tpu.memory_space<vmem>>, %arg6: memref<1x4x8x8xbf16, #tpu.memory_space<vmem>>, %arg7: memref<1x4x8x8xbf16, #tpu.memory_space<vmem>>, %arg8: memref<1x4x8x8xbf16, #tpu.memory_space<vmem>>) attributes {dimension_semantics = [#tpu.dimension_semantics<parallel>, #tpu.dimension_semantics<parallel>], iteration_bounds = array<i64: 2, 1>, scalar_prefetch = 0 : i64, scratch_operands = 0 : i64, tpu.core_type = #tpu.core_type<tc>, window_params = [{transform_indices = @transform_0, window_bounds = array<i64: 1, 8, 32>}, {pipeline_mode = #tpu.pipeline_mode<synchronous>, transform_indices = @transform_1, window_bounds = array<i64: 32, 32>}, {pipeline_mode = #tpu.pipeline_mode<synchronous>, transform_indices = @transform_2, window_bounds = array<i64: 32, 32>}, {pipeline_mode = #tpu.pipeline_mode<synchronous>, transform_indices = @transform_3, window_bounds = array<i64: 32, 32>}, {transform_indices = @transform_4, window_bounds = array<i64: 1, 4, 8, 8>}, {transform_indices = @transform_5, window_bounds = array<i64: 1, 4, 8, 8>}, {transform_indices = @transform_6, window_bounds = array<i64: 1, 4, 8, 8>}]} {
    %c0 = arith.constant 0 : index
    %c0_0 = arith.constant 0 : index
    %c0_1 = arith.constant 0 : index
    %0 = vector.load %arg2[%c0, %c0_0, %c0_1] : memref<1x8x32xbf16, #tpu.memory_space<vmem>>, vector<1x8x32xbf16>
    %1 = vector.shape_cast %0 : vector<1x8x32xbf16> to vector<8x32xbf16>
    %c0_2 = arith.constant 0 : index
    %c0_3 = arith.constant 0 : index
    %2 = vector.load %arg3[%c0_2, %c0_3] : memref<32x32xbf16, #tpu.memory_space<vmem>>, vector<32x32xbf16>
    %cst = arith.constant dense<0.000000e+00> : vector<8x32xf32>
    %3 = tpu.matmul %1, %2, %cst {dimension_numbers = #tpu.dot_dimension_numbers<[1], [0], [0], [1], [0, 0, 1, 1], [], []>} : vector<8x32xbf16>, vector<32x32xbf16>, vector<8x32xf32> -> vector<8x32xf32>
    %cst_4 = arith.constant 0.353553385 : f32
    %4 = vector.broadcast %cst_4 : f32 to vector<8x32xf32>
    %5 = arith.mulf %3, %4 : vector<8x32xf32>
    %6 = vector.shape_cast %5 : vector<8x32xf32> to vector<8x4x8xf32>
    %7 = tpu.transpose %6, [1, 0, 2] : vector<8x4x8xf32> -> vector<4x8x8xf32>
    %8 = arith.truncf %7 : vector<4x8x8xf32> to vector<4x8x8xbf16>
    %c0_5 = arith.constant 0 : index
    %c0_6 = arith.constant 0 : index
    %c0_7 = arith.constant 0 : index
    %c0_8 = arith.constant 0 : index
    %9 = vector.load %arg6[%c0_5, %c0_6, %c0_7, %c0_8] : memref<1x4x8x8xbf16, #tpu.memory_space<vmem>>, vector<1x4x8x8xbf16>
    %10 = vector.shape_cast %9 : vector<1x4x8x8xbf16> to vector<4x8x8xbf16>
    %11 = vector.shape_cast %8 : vector<4x8x8xbf16> to vector<1x4x8x8xbf16>
    tpu.vector_store %arg6[%c0_5, %c0_6, %c0_7, %c0_8], %11 {strides = array<i32>} : memref<1x4x8x8xbf16, #tpu.memory_space<vmem>>, vector<1x4x8x8xbf16>,
    %c0_9 = arith.constant 0 : index
    %c0_10 = arith.constant 0 : index
    %12 = vector.load %arg4[%c0_9, %c0_10] : memref<32x32xbf16, #tpu.memory_space<vmem>>, vector<32x32xbf16>
    %cst_11 = arith.constant dense<0.000000e+00> : vector<8x32xf32>
    %13 = tpu.matmul %1, %12, %cst_11 {dimension_numbers = #tpu.dot_dimension_numbers<[1], [0], [0], [1], [0, 0, 1, 1], [], []>} : vector<8x32xbf16>, vector<32x32xbf16>, vector<8x32xf32> -> vector<8x32xf32>
    %14 = vector.shape_cast %13 : vector<8x32xf32> to vector<8x4x8xf32>
    %15 = tpu.transpose %14, [1, 0, 2] : vector<8x4x8xf32> -> vector<4x8x8xf32>
    %16 = arith.truncf %15 : vector<4x8x8xf32> to vector<4x8x8xbf16>
    %c0_12 = arith.constant 0 : index
    %c0_13 = arith.constant 0 : index
    %c0_14 = arith.constant 0 : index
    %c0_15 = arith.constant 0 : index
    %17 = vector.load %arg7[%c0_12, %c0_13, %c0_14, %c0_15] : memref<1x4x8x8xbf16, #tpu.memory_space<vmem>>, vector<1x4x8x8xbf16>
    %18 = vector.shape_cast %17 : vector<1x4x8x8xbf16> to vector<4x8x8xbf16>
    %19 = vector.shape_cast %16 : vector<4x8x8xbf16> to vector<1x4x8x8xbf16>
    tpu.vector_store %arg7[%c0_12, %c0_13, %c0_14, %c0_15], %19 {strides = array<i32>} : memref<1x4x8x8xbf16, #tpu.memory_space<vmem>>, vector<1x4x8x8xbf16>,
    %c0_16 = arith.constant 0 : index
    %c0_17 = arith.constant 0 : index
    %20 = vector.load %arg5[%c0_16, %c0_17] : memref<32x32xbf16, #tpu.memory_space<vmem>>, vector<32x32xbf16>
    %cst_18 = arith.constant dense<0.000000e+00> : vector<8x32xf32>
    %21 = tpu.matmul %1, %20, %cst_18 {dimension_numbers = #tpu.dot_dimension_numbers<[1], [0], [0], [1], [0, 0, 1, 1], [], []>} : vector<8x32xbf16>, vector<32x32xbf16>, vector<8x32xf32> -> vector<8x32xf32>
    %22 = vector.shape_cast %21 : vector<8x32xf32> to vector<8x4x8xf32>
    %23 = tpu.transpose %22, [1, 0, 2] : vector<8x4x8xf32> -> vector<4x8x8xf32>
    %24 = arith.truncf %23 : vector<4x8x8xf32> to vector<4x8x8xbf16>
    %c0_19 = arith.constant 0 : index
    %c0_20 = arith.constant 0 : index
    %c0_21 = arith.constant 0 : index
    %c0_22 = arith.constant 0 : index
    %25 = vector.load %arg8[%c0_19, %c0_20, %c0_21, %c0_22] : memref<1x4x8x8xbf16, #tpu.memory_space<vmem>>, vector<1x4x8x8xbf16>
    %26 = vector.shape_cast %25 : vector<1x4x8x8xbf16> to vector<4x8x8xbf16>
    %27 = vector.shape_cast %24 : vector<4x8x8xbf16> to vector<1x4x8x8xbf16>
    tpu.vector_store %arg8[%c0_19, %c0_20, %c0_21, %c0_22], %27 {strides = array<i32>} : memref<1x4x8x8xbf16, #tpu.memory_space<vmem>>, vector<1x4x8x8xbf16>,
    return
  }
  func.func @transform_0(%arg0: i32, %arg1: i32) -> (i32, i32, i32) {
    %c0_i32 = arith.constant 0 : i32
    %c0_i32_0 = arith.constant 0 : i32
    return %arg0, %arg1, %c0_i32 : i32, i32, i32
  }
  func.func @transform_1(%arg0: i32, %arg1: i32) -> (i32, i32) {
    %c0_i32 = arith.constant 0 : i32
    %c0_i32_0 = arith.constant 0 : i32
    %c0_i32_1 = arith.constant 0 : i32
    return %c0_i32, %c0_i32_0 : i32, i32
  }
  func.func @transform_2(%arg0: i32, %arg1: i32) -> (i32, i32) {
    %c0_i32 = arith.constant 0 : i32
    %c0_i32_0 = arith.constant 0 : i32
    %c0_i32_1 = arith.constant 0 : i32
    return %c0_i32, %c0_i32_0 : i32, i32
  }
  func.func @transform_3(%arg0: i32, %arg1: i32) -> (i32, i32) {
    %c0_i32 = arith.constant 0 : i32
    %c0_i32_0 = arith.constant 0 : i32
    %c0_i32_1 = arith.constant 0 : i32
    return %c0_i32, %c0_i32_0 : i32, i32
  }
  func.func @transform_4(%arg0: i32, %arg1: i32) -> (i32, i32, i32, i32) {
    %c0_i32 = arith.constant 0 : i32
    %c0_i32_0 = arith.constant 0 : i32
    %c0_i32_1 = arith.constant 0 : i32
    return %arg0, %c0_i32, %arg1, %c0_i32_0 : i32, i32, i32, i32
  }
  func.func @transform_5(%arg0: i32, %arg1: i32) -> (i32, i32, i32, i32) {
    %c0_i32 = arith.constant 0 : i32
    %c0_i32_0 = arith.constant 0 : i32
    %c0_i32_1 = arith.constant 0 : i32
    return %arg0, %c0_i32, %arg1, %c0_i32_0 : i32, i32, i32, i32
  }
  func.func @transform_6(%arg0: i32, %arg1: i32) -> (i32, i32, i32, i32) {
    %c0_i32 = arith.constant 0 : i32
    %c0_i32_0 = arith.constant 0 : i32
    %c0_i32_1 = arith.constant 0 : i32
    return %arg0, %c0_i32, %arg1, %c0_i32_0 : i32, i32, i32, i32
  }
}

</mosaic_0001>

<bundles_post_ra>
// kernel: tpu_custom_call.1
= control target key start
LH: loop header
LB: loop body
LE: loop exit
PB: predicated region body
PF: predicated region fallthrough
CT: control target
= control target key end

     0   :  { %12 = vsyncpa [#allocation3], 0  ;;  %s2199_s0 = inlined_call_operand.hbm [shape: bf16[2,8,32], index: 0, kind: input, shape index: {}]   ;;  %s2200_s1 = inlined_call_operand.hbm [shape: bf16[32,32], index: 1, kind: input, shape index: {}]   ;;  %s2201_s2 = inlined_call_operand.hbm [shape: bf16[32,32], index: 2, kind: input, shape index: {}]   ;;  %s2202_s3 = inlined_call_operand.hbm [shape: bf16[32,32], index: 3, kind: input, shape index: {}]   ;;  %s2203_s4 = inlined_call_operand.hbm [shape: bf16[2,4,8,8], index: 4, kind: output, shape index: {0}]   ;;  %s2204_s5 = inlined_call_operand.hbm [shape: bf16[2,4,8,8], index: 5, kind: output, shape index: {1}]   ;;  %s2205_s6 = inlined_call_operand.hbm [shape: bf16[2,4,8,8], index: 6, kind: output, shape index: {2}]  }
   0x1   :  { %14 = vsyncpa [#allocation3 + $0x1], 0 }
   0x2   :  { %15 = vsyncpa [#allocation6], 0 }
   0x3   :  { %16 = vsyncpa [#allocation9], 0 }
   0x4   :  { %17 = vsyncpa [#allocation4], 0 }
   0x5   :  { %19 = vsyncpa [#allocation4 + $0x1], 0 }
   0x6   :  { %20 = vsyncpa [#allocation12], 0 }
   0x7   :  { %22 = vsyncpa [#allocation12 + $0x1], 0  ;;  %s1743_s21 = smov 0   ;;  %s1745_s22 = smov 0  }
   0x8   :  { %s1747_s23 = smov 0   ;;  %s1749_s24 = smov 0  }
   0x9   :  { %s1751_s25 = smov 0   ;;  %s1753_s26 = smov 0  }
   0xa LB: > { %2212 = sst [smem:[#allocation19_spill]] %s1668_s21  ;;  %s1774_s27 = sadd.s32 4294967295, %s1688_s26   ;;  %s1688_s26 = sphi %s1753_s26, %s28_s26   ;;  %s1684_s25 = sphi %s1751_s25, %s2237_s25   ;;  %s1680_s24 = sphi %s1749_s24, %s2236_s24   ;;  %s1676_s23 = sphi %s1747_s23, %s2235_s23   ;;  %s1672_s22 = sphi %s1745_s22, %s2234_s22   ;;  %s1668_s21 = sphi %s1743_s21, %s2233_s21  }
   0xb   : > { %s2207_s28 = sadd.s32 4294967294, %s1688_s26   ;;  %p62_p0 = scmp.ne.s32.totalorder %s1672_s22, %s1668_s21 }
   0xc   : > { %p2206_p1 = scmp.eq.s32.totalorder %s1774_s27, 0  ;;  %p157_p3 = scmp.eq.s32.totalorder %s2207_s28, 1 }
   0xd   : > { %p1227_p5 = scmp.ge.s32.totalorder %s1688_s26, 1  ;;  %p220_p7 = scmp.lt.s32.totalorder %s1688_s26, 3 }
   0xe   : > { %p1785_p4 = por %p2206_p1, %p62_p0  ;;  %p1790_p6 = por %p157_p3, %p62_p0 }
   0xf   : > { %p1795_p8 = pnand %p1227_p5, %p220_p7  ;;  %s1690_s8 = smov [#allocation5]  }
  0x10   : > { %s2213_s29 = scalar_select %p1785_p4, 1, 0 }
  0x11   : > { %s2214_s30 = scalar_select %p1790_p6, 1, 0 }
  0x12   : > { %s2216_s7 = scalar_select %p1795_p8, 1, 0 }
  0x13   : > { %2215 = sst [smem:[#allocation20_spill]] %s2214_s30  ;;  %s232_s9 = sshll.u32 %s1690_s8, 4  ;;  %s1799_s9 = int_to_ptr.vmem [resolvable:$true] %s232_s9 }
  0x14   : > { %p1324_p9 = pneg %p1795_p8  ;;  %s1691_s11 = smov [#allocation7]  }
  0x15   : > { %s245_s12 = sshll.u32 %s1691_s11, 4  ;;  %s1692_s13 = smov [#allocation8]   ;;  %s1810_s12 = int_to_ptr.vmem [resolvable:$true] %s245_s12 }
  0x16   : > { %p1806_p11 = pnand %p1324_p9, %p2206_p1  ;;  %s1812_s14 = sshll.u32 %s1692_s13, 4  ;;  %s259_s14 = int_to_ptr.vmem [resolvable:$true] %s1812_s14 }
  0x17   : > { %s1424_s17 = scalar_lea.hbm %s2200_s1, 256 }
  0x18   : > { %p1425_p12 = scmp.ne.s32.totalorder %s2200_s1, %s1424_s17  ;;  %p1822_p13 = pneg %p1806_p11 }
  0x19   : > { %p1431_p5 = scmp.lt.u32.totalorder %s1424_s17, %s2200_s1 }
  0x1a   : > { %p1427_p0 = pnand %p1822_p13, %p1425_p12 }
  0x1c   : > { %p1428_p3 = pneg %p1427_p0 }
  0x1e   : > { %p1433_p7 = pnand %p1431_p5, %p1428_p3 }
  0x20   : > { %1436 = shalt.err (!%p1433_p7)
}
  0x21   : > { %s1437_s13 = scalar_lea.vmem %s1799_s9, 256  ;;  %p1445_p2 = scmp.lt.s32.totalorder %s1799_s9, %s1799_s9 }
  0x22   : > { %p1438_p9 = scmp.ne.s32.totalorder %s1799_s9, %s1437_s13  ;;  %p1446_p6 = scmp.lt.s32.totalorder %s1437_s13, %s1437_s13 }
  0x24   : > { %p1440_p10 = pnand %p1438_p9, %p1822_p13  ;;  %p1447_p12 = por %p1446_p6, %p1445_p2 }
  0x26   : > { %p1441_p1 = pneg %p1440_p10 }
  0x28   : > { %p1448_p0 = pnand %p1447_p12, %p1441_p1 }
  0x2a   : > { %1451 = shalt.err (!%p1448_p0)
}
  0x2b   : > { %s1693_s15 = smov 64   ;;  %s1694_s16 = smov 4  }
  0x2c   : > { %1327 = dma.hbm_to_vmem [thread:$0]  (!%p1806_p11), %s2200_s1, 256, %s1799_s9, [#allocation6], %s1693_s15, %s1693_s15, %s1694_s16  }
  0x2d   : > { %s1452_s11 = scalar_lea.hbm %s2201_s2, 256 }
  0x2e   : > { %p1453_p1 = scmp.ne.s32.totalorder %s2201_s2, %s1452_s11  ;;  %p1459_p10 = scmp.lt.u32.totalorder %s1452_s11, %s2201_s2 }
  0x30   : > { %p1455_p2 = pnand %p1453_p1, %p1822_p13 }
  0x32   : > { %p1456_p6 = pneg %p1455_p2 }
  0x34   : > { %p1461_p3 = pnand %p1459_p10, %p1456_p6 }
  0x36   : > { %1464 = shalt.err (!%p1461_p3)
}
  0x37   : > { %s1465_s9 = scalar_lea.vmem %s1810_s12, 256  ;;  %p1473_p12 = scmp.lt.s32.totalorder %s1810_s12, %s1810_s12 }
  0x38   : > { %p1466_p5 = scmp.ne.s32.totalorder %s1810_s12, %s1465_s9  ;;  %p1474_p0 = scmp.lt.s32.totalorder %s1465_s9, %s1465_s9 }
  0x3a   : > { %p1468_p7 = pnand %p1466_p5, %p1822_p13  ;;  %p1475_p1 = por %p1474_p0, %p1473_p12 }
  0x3c   : > { %p1469_p9 = pneg %p1468_p7 }
  0x3e   : > { %p1476_p2 = pnand %p1475_p1, %p1469_p9 }
  0x40   : > { %1479 = shalt.err (!%p1476_p2)
}
  0x41   : > { %1330 = dma.hbm_to_vmem [thread:$0]  (!%p1806_p11), %s2201_s2, 256, %s1810_s12, [#allocation6], %s1693_s15, %s1693_s15, %s1694_s16  }
  0x42   : > { %s1480_s18 = scalar_lea.hbm %s2202_s3, 256 }
  0x43   : > { %p1481_p6 = scmp.ne.s32.totalorder %s2202_s3, %s1480_s18  ;;  %p1487_p5 = scmp.lt.u32.totalorder %s1480_s18, %s2202_s3 }
  0x45   : > { %p1483_p10 = pnand %p1481_p6, %p1822_p13 }
  0x47   : > { %p1484_p3 = pneg %p1483_p10 }
  0x49   : > { %p1489_p7 = pnand %p1487_p5, %p1484_p3 }
  0x4b   : > { %1492 = shalt.err (!%p1489_p7)
}
  0x4c   : > { %s1493_s9 = scalar_lea.vmem %s259_s14, 256  ;;  %p1501_p1 = scmp.lt.s32.totalorder %s259_s14, %s259_s14 }
  0x4d   : > { %p1494_p9 = scmp.ne.s32.totalorder %s259_s14, %s1493_s9  ;;  %p1502_p2 = scmp.lt.s32.totalorder %s1493_s9, %s1493_s9 }
  0x4f   : > { %p1496_p12 = pnand %p1494_p9, %p1822_p13  ;;  %p1503_p4 = por %p1502_p2, %p1501_p1 }
  0x51   : > { %p1497_p0 = pneg %p1496_p12 }
  0x53   : > { %p1504_p8 = pnand %p1503_p4, %p1497_p0 }
  0x55   : > { %1507 = shalt.err (!%p1504_p8)
}
  0x56   : > { %1333 = dma.hbm_to_vmem [thread:$0]  (!%p1806_p11), %s2202_s3, 256, %s259_s14, [#allocation9], %s1693_s15, %s1693_s15, %s1694_s16  }
  0x57   : > { %s49_s20 = sadd.s32 1, %s1676_s23  ;;  %s40_s10 = sadd.s32 1, %s1684_s25 }
  0x58   : > { %p56_p4 = scmp.ne.s32.totalorder %s1676_s23, %s1672_s22  ;;  %p42_p8 = scmp.ge.s32.totalorder %s40_s10, 2 }
  0x59   : > { %p57_p13 = scmp.eq.s32.totalorder %s1688_s26, 0  ;;  %p2219_p6 = scmp.eq.s32.totalorder %s1774_s27, 1 }
  0x5a   : > { %p1351_p3 = scmp.lt.s32.totalorder %s1688_s26, 2  ;;  %s2239_s10 = smov (%p42_p8, %s40_s10), 0 }
  0x5b   : > { %p1901_p10 = por %p2219_p6, %p56_p4  ;;  %p58_p5 = por %p57_p13, %p56_p4 }
  0x5c   : > { %s272_s30 = sand.u32 1, %s1676_s23   ;;  %s44_s17 = ssub.s32 %s1684_s25, %s2239_s10 }
  0x5d   : > { %p47_p7 = scmp.eq.s32.totalorder %s44_s17, 0  ;;  %s1232_s14 = sshll.u32 %s272_s30, 2 }
  0x5e   : > { %s1233_s15 = sshll.u32 %s1684_s25, 6  ;;  %s276_s11 = scalar_lea.vmem [#allocation2], %s1232_s14 }
  0x5f   : > { %s1913_s16 = scalar_select %p47_p7, %s1676_s23, %s49_s20  }
  0x60   : > { %s1918_s8 = scalar_lea.hbm %s2199_s0, %s1233_s15  ;;  %s284_s13 = sshll.u32 %s276_s11, 4  ;;  %s1920_s13 = int_to_ptr.vmem [resolvable:$true] %s284_s13 }
  0x61   : > { %p1924_p11 = pnand %p1351_p3, %p58_p5  ;;  %s273_s12 = scalar_lea.sflag [#allocation3], %s272_s30 }
  0x62   : > { %s1508_s21 = scalar_lea.hbm %s1918_s8, 64  ;;  %s1513_s14 = scalar_lea.hbm %s2199_s0, 128 }
  0x63   : > { %p1509_p9 = scmp.ne.s32.totalorder %s1918_s8, %s1508_s21  ;;  %p1510_p12 = pneg %p1924_p11 }
  0x64   : > { %p1514_p2 = scmp.lt.u32.totalorder %s1918_s8, %s2199_s0  ;;  %p1515_p4 = scmp.lt.u32.totalorder %s1513_s14, %s1508_s21 }
  0x65   : > { %p1511_p0 = pnand %p1510_p12, %p1509_p9  ;;  %p1517_p13 = scmp.lt.u32.totalorder %s1508_s21, %s1918_s8 }
  0x66   : > { %p1516_p8 = por %p1515_p4, %p1514_p2 }
  0x67   : > { %p1512_p1 = pneg %p1511_p0 }
  0x68   : > { %p1518_p6 = por %p1517_p13, %p1516_p8 }
  0x6a   : > { %p1519_p3 = pnand %p1518_p6, %p1512_p1 }
  0x6c   : > { %1522 = shalt.err (!%p1519_p3)
}
  0x6d   : > { %s1523_s30 = scalar_lea.vmem %s1920_s13, 64  ;;  %s1695_s19 = smov [#allocation2]  }
  0x6e   : > { %p1524_p5 = scmp.ne.s32.totalorder %s1920_s13, %s1523_s30  ;;  %s1528_s11 = sshll.u32 %s1695_s19, 4  ;;  %s1529_s11 = int_to_ptr.vmem [resolvable:$false] %s1528_s11 }
  0x6f   : > { %s1530_s20 = scalar_lea.vmem %s1529_s11, 128  ;;  %p1531_p0 = scmp.lt.s32.totalorder %s1920_s13, %s1529_s11 }
  0x70   : > { %p1526_p7 = pnand %p1524_p5, %p1510_p12  ;;  %p1532_p2 = scmp.lt.s32.totalorder %s1530_s20, %s1523_s30 }
  0x72   : > { %p1527_p9 = pneg %p1526_p7  ;;  %p1533_p4 = por %p1532_p2, %p1531_p0 }
  0x74   : > { %p1534_p8 = pnand %p1533_p4, %p1527_p9 }
  0x76   : > { %1537 = shalt.err (!%p1534_p8)
}
  0x77   : > { %1337 = dma.hbm_to_vmem [thread:$0]  (!%p1924_p11), %s1918_s8, 64, %s1920_s13, %s273_s12  }
  0x78   : > { %p2222_p1 = scmp.ne.s32.totalorder %s2216_s7, 0 }
  0x79   : > { %s1956_s21 = sand.u32 (!%p2222_p1), 1, %s1672_s22   ;;  %p2223_p12 = scmp.ne.s32.totalorder (!%p2222_p1), %s2213_s29, 0 }
  0x7a   : > { %293 = sbr.rel (%p2222_p1) target bundleno = 564 (0x234), region = 36  ;;  %s1235_s17 = sshll.u32 (!%p2222_p1), %s1956_s21, 2 }
  0x7b   : > { %s296_s14 = scalar_lea.sflag (!%p2222_p1), [#allocation3], %s1956_s21  ;;  %s299_s15 = scalar_lea.vmem (!%p2222_p1), [#allocation2], %s1235_s17 }
  0x81   : > { %1647 = dma.done.wait (%p2223_p12), %s296_s14, 64  }
  0x82   : > { %1649 = vsyncadd (%p2223_p12), %s296_s14, 4294967232  ;;  %p2224_p13 = scmp.eq.s32.totalorder %s1774_s27, 0 }
  0x84   : > { %1651 = dma.done.wait (%p2224_p13), [#allocation6], 512   ;;  %p2225_p11 = pmov %p2224_p13 }
  0x86   : > { %1653 = vsyncadd (%p2225_p11), [#allocation6], 4294966784  ;;  %p2226_p6 = pmov %p2225_p11 }
  0x88   : > { %1655 = dma.done.wait (%p2226_p6), [#allocation9], 256   ;;  %p2227_p3 = pmov %p2226_p6 }
  0x89   : > { %v1696_v0 = vmov 0.0   ;;  %vm1697_vm0 = vmmov 0   ;;  %v1418_v1 = vld [vmem:[#allocation7] sm:$0xff]   ;;  %v1419_v2 = vld [vmem:[#allocation5] sm:$0xff]   ;;  %v1420_v3 = vld [vmem:[#allocation7 + $0x8] sm:$0xff]   ;;  %vm368_vm1 = vcmask 261120   ;;  %v428_v23 = vlaneseq }
  0x8a   : > { %1657 = vsyncadd (%p2227_p3), [#allocation9], 4294967040  ;;  %1288 = vmatprep.subr.bf16.mxu1 %v1696_v0  ;;  %1280 = vmatprep.subr.bf16.mxu0 %v1696_v0  ;;  %v1421_v4 = vld [vmem:[#allocation5 + $0x8] sm:$0xff]   ;;  %v351_v5 = vld [vmem:[%s299_s15] sm:$0xf]  ;;  %s1698_s29 = smov 104  }
  0x8b   : > { %1292 = vmatprep.mubr.msk.bf16.mxu1 %vm1697_vm0, %v1696_v0  ;;  %1284 = vmatprep.mubr.msk.bf16.mxu0 %vm1697_vm0, %v1696_v0  ;;  %v1422_v6 = vld [vmem:[#allocation8] sm:$0xff]   ;;  %v1423_v7 = vld [vmem:[#allocation8 + $0x8] sm:$0xff]   ;;  %s1699_s7 = smov 120   ;;  %s1700_s8 = smov 112   ;;  %v1701_v21 = vmov 1983009808  }
  0x8c   : > { %1289 = vmatpush3.bf16.msra.mxu1 %v1418_v1  ;;  %1281 = vmatpush3.bf16.msra.mxu0 %v1419_v2  ;;  %v426_v22 = vunpack.c.l.s4 %v1701_v21  ;;  %v1702_v24 = vmov 1934713408   ;;  %v429_v27 = vshrl.u32 %v428_v23, 7  ;;  %vm563_vm2 = vcmask 60416   ;;  %s2007_s13 = sshll.u32 %s1956_s21, 4  ;;  %s993_s9 = sand.u32 1, %s1774_s27  }
  0x8d   : > { %1290 = vmatprep.subr.bf16.mxu1 %v1696_v0  ;;  %1282 = vmatprep.subr.bf16.mxu0 %v1696_v0  ;;  %v458_v25 = vunpack.c.l.s4 %v1702_v24  ;;  %s2019_s12 = sshll.u32 %s1680_s24, 8  ;;  %s342_s18 = scalar_lea.vmem [#allocation11], %s2007_s13 }
  0x8e   : > { %v427_v26 = vunpack.c.0.s8 %v426_v22  ;;  %s1030_s30 = sshll.u32 %s342_s18, 4  ;;  %s2026_s11 = scalar_lea.hbm %s2204_s5, %s2019_s12  ;;  %s2028_s30 = int_to_ptr.vmem [resolvable:$true] %s1030_s30 }
  0x8f   : > { %v459_v30 = vunpack.c.0.s8 %v458_v25  ;;  %s2043_s20 = scalar_lea.vmem [#allocation10], %s2007_s13  ;;  %s2048_s14 = scalar_lea.sflag [#allocation12], %s993_s9 }
  0x90   : > { %1291 = vmatpush3.bf16.msra.mxu1 %v1420_v3  ;;  %1283 = vmatpush3.bf16.msra.mxu0 %v1421_v4  ;;  %v1980_v31 = vsub.s32 %v427_v26, %v429_v27  ;;  %s1013_s17 = sshll.u32 %s2043_s20, 4  ;;  %s1538_s15 = scalar_lea.vmem %s2028_s30, 256  ;;  %s2087_s17 = int_to_ptr.vmem [resolvable:$true] %s1013_s17 }
  0x91   : > { %1296 = vmatprep.subr.bf16.mxu0 %v1696_v0  ;;  %v1982_v38 = vsub.s32 %v459_v30, %v429_v27  ;;  %p1539_p5 = scmp.ne.s32.totalorder %s2028_s30, %s1538_s15 }
  0x93   : > { %1293 = vmatmul.mubr.msk.bf16.vlgmr.msra.gmra.mrb[0].mxu1 %vm368_vm1, %v351_v5  ;;  %1285 = vmatmul.mubr.msk.bf16.vlgmr.msra.gmra.mrb[0].mxu0 %vm368_vm1, %v351_v5  ;;  %p1540_p7 = pnand %p1539_p5, %p1901_p10 }
  0x94   : > { %1297 = vmatpush3.bf16.msra.mxu0 %v1422_v6  ;;  %1300 = vmatprep.mubr.msk.bf16.mxu0 %vm1697_vm0, %v1696_v0 }
  0x95   : > { %1298 = vmatprep.subr.bf16.mxu0 %v1696_v0  ;;  %p1541_p9 = pneg %p1540_p7 }
  0x98   : > { %1299 = vmatpush3.bf16.msra.mxu0 %v1423_v7 }
  0x9b   : > { %1301 = vmatmul.mubr.msk.bf16.vlgmr.msra.gmra.mrb[4].mxu0 %vm368_vm1, %v351_v5 }
 0x166   : > { %v618_v8 = vpop.f32.mrb[0].mxu1  ;;  %v406_v9 = vpop.f32.mrb[0].mxu0 }
 0x167   : > { %631 = vrot.lane.b32.xlu1 %v618_v8, %s1698_s29  ;;  %625 = vrot.lane.b32.xlu0 %v618_v8, %s1699_s7  ;;  %v1294_v10 = vpop.f32.mrb[1].mxu1  ;;  %v412_v11 = vmul.f32 0.35355338, %v406_v9  ;;  %v1286_v12 = vpop.f32.mrb[1].mxu0 }
 0x168   : > { %v621_v13 = vpop.f32.mrb[2].mxu1  ;;  %v409_v14 = vpop.f32.mrb[2].mxu0 }
 0x169   : > { %v1295_v15 = vpop.f32.mrb[3].mxu1  ;;  %v1287_v16 = vpop.f32.mrb[3].mxu0 }
 0x16b   : > { %628 = vrot.lane.b32.xlu0 %v618_v8, %s1700_s8  ;;  %414 = vrot.lane.b32.xlu1 %v412_v11, %s1699_s7 }
 0x16e   : > { %v1975_v17 = vpop.f32.mrb[4].mxu0 }
 0x16f   : > { %417 = vrot.lane.b32.xlu0 %v412_v11, %s1700_s8  ;;  %420 = vrot.lane.b32.xlu1 %v412_v11, %s1698_s29  ;;  %v1302_v18 = vpop.f32.mrb[5].mxu0 }
 0x170   : > { %v831_v19 = vpop.f32.mrb[6].mxu0 }
 0x171   : > { %v1303_v20 = vpop.f32.mrb[7].mxu0 }
 0x173   : > { %838 = vrot.lane.b32.xlu1 %v1975_v17, %s1700_s8  ;;  %835 = vrot.lane.b32.xlu0 %v1975_v17, %s1699_s7 }
 0x177   : > { %841 = vrot.lane.b32.xlu0 %v1975_v17, %s1698_s29  ;;  %s1703_s29 = smov [#allocation11]  }
 0x178   : > { %s1542_s7 = sshll.u32 %s1703_s29, 4  ;;  %s1543_s7 = int_to_ptr.vmem [resolvable:$false] %s1542_s7 }
 0x179   : > { %s1544_s8 = scalar_lea.vmem %s1543_s7, 512  ;;  %p1545_p0 = scmp.lt.s32.totalorder %s2028_s30, %s1543_s7 }
 0x17a   : > { %p1546_p2 = scmp.lt.s32.totalorder %s1544_s8, %s1538_s15 }
 0x17c   : > { %p1547_p4 = por %p1546_p2, %p1545_p0 }
 0x17e   : > { %p1548_p8 = pnand %p1547_p4, %p1541_p9 }
 0x1d9   : > { %v632_v28 = vpop.permute.xlu1 %631  ;;  %v626_v29 = vpop.permute.xlu0 %625 }
 0x1da   : > { %v650_v32 = vcombine.low %v626_v29, %v632_v28  ;;  %v651_v33 = vcombine.high %v626_v29, %v632_v28 }
 0x1dc   : > { %v658_v39 = vrot.slane %v650_v32, %v1980_v31  ;;  %v665_v40 = vrot.slane %v651_v33, %v1980_v31 }
 0x1dd   : > { %v629_v34 = vpop.permute.xlu0 %628  ;;  %v415_v35 = vpop.permute.xlu1 %414 }
 0x1de   : > { %v634_v36 = vcombine.low %v618_v8, %v629_v34  ;;  %v635_v37 = vcombine.high %v618_v8, %v629_v34 }
 0x1e0   : > { %v642_v41 = vrot.slane %v634_v36, %v1980_v31  ;;  %v649_v42 = vrot.slane %v635_v37, %v1980_v31 }
 0x1e1   : > { %v418_v43 = vpop.permute.xlu0 %417  ;;  %v421_v44 = vpop.permute.xlu1 %420 }
 0x1e2   : > { %v666_v45 = vcombine.low %v642_v41, %v658_v39  ;;  %v667_v46 = vcombine.high %v642_v41, %v658_v39  ;;  %v682_v47 = vcombine.low %v649_v42, %v665_v40  ;;  %v683_v48 = vcombine.high %v649_v42, %v665_v40 }
 0x1e3   : > { %v423_v49 = vcombine.low %v412_v11, %v418_v43  ;;  %v424_v50 = vcombine.high %v412_v11, %v418_v43  ;;  %v439_v51 = vcombine.low %v415_v35, %v421_v44  ;;  %v440_v52 = vcombine.high %v415_v35, %v421_v44 }
 0x1e4   : > { %v674_v53 = vrot.slane %v666_v45, %v1982_v38  ;;  %v681_v54 = vrot.slane %v667_v46, %v1982_v38  ;;  %v690_v55 = vrot.slane %v682_v47, %v1982_v38  ;;  %v697_v56 = vrot.slane %v683_v48, %v1982_v38 }
 0x1e5   : > { %v431_v57 = vrot.slane %v423_v49, %v1980_v31  ;;  %v438_v58 = vrot.slane %v424_v50, %v1980_v31  ;;  %v447_v59 = vrot.slane %v439_v51, %v1980_v31  ;;  %v454_v60 = vrot.slane %v440_v52, %v1980_v31  ;;  %v2004_v13 = vpop.permute.xlu0 %835  ;;  %v839_v41 = vpop.permute.xlu1 %838 }
 0x1e6   : > { %v702_v61 = vcombine.low %v674_v53, %v681_v54  ;;  %v1250_v62 = vcombine.high %v674_v53, %v681_v54  ;;  %v718_v63 = vcombine.low %v690_v55, %v697_v56  ;;  %v1251_v0 = vcombine.high %v690_v55, %v697_v56 }
 0x1e7   : > { %v455_v1 = vcombine.low %v431_v57, %v447_v59  ;;  %v456_v2 = vcombine.high %v431_v57, %v447_v59  ;;  %v471_v3 = vcombine.low %v438_v58, %v454_v60  ;;  %v472_v4 = vcombine.high %v438_v58, %v454_v60 }
 0x1e8   : > { %v709_v5 = vrot.slane %v702_v61, %v1980_v31  ;;  %v717_v6 = vrot.slane %v1250_v62, %v1980_v31  ;;  %v725_v7 = vrot.slane %v718_v63, %v1980_v31  ;;  %v733_v8 = vrot.slane %v1251_v0, %v1980_v31 }
 0x1e9   : > { %v463_v9 = vrot.slane %v455_v1, %v1982_v38  ;;  %v470_v10 = vrot.slane %v456_v2, %v1982_v38  ;;  %v479_v11 = vrot.slane %v471_v3, %v1982_v38  ;;  %v486_v12 = vrot.slane %v472_v4, %v1982_v38  ;;  %v842_v42 = vpop.permute.xlu0 %841 }
 0x1ea   : > { %v734_v14 = vcombine.low %v709_v5, %v717_v6  ;;  %v735_v15 = vcombine.high %v709_v5, %v717_v6  ;;  %v750_v16 = vcombine.low %v725_v7, %v733_v8  ;;  %v751_v18 = vcombine.high %v725_v7, %v733_v8 }
 0x1eb   : > { %v491_v19 = vcombine.low %v463_v9, %v470_v10  ;;  %v1245_v20 = vcombine.high %v463_v9, %v470_v10  ;;  %v507_v21 = vcombine.low %v479_v11, %v486_v12  ;;  %v1246_v22 = vcombine.high %v479_v11, %v486_v12 }
 0x1ec   : > { %v742_v23 = vrot.slane %v734_v14, %v1982_v38  ;;  %v749_v24 = vrot.slane %v735_v15, %v1982_v38  ;;  %v758_v25 = vrot.slane %v750_v16, %v1982_v38  ;;  %v765_v26 = vrot.slane %v751_v18, %v1982_v38 }
 0x1ed   : > { %v498_v27 = vrot.slane %v491_v19, %v1980_v31  ;;  %v506_v28 = vrot.slane %v1245_v20, %v1980_v31  ;;  %v514_v29 = vrot.slane %v507_v21, %v1980_v31  ;;  %v522_v30 = vrot.slane %v1246_v22, %v1980_v31 }
 0x1ee   : > { %v766_v32 = vcombine.low %v742_v23, %v758_v25  ;;  %v767_v33 = vcombine.high %v742_v23, %v758_v25  ;;  %v768_v34 = vcombine.low %v749_v24, %v765_v26  ;;  %v769_v35 = vcombine.high %v749_v24, %v765_v26 }
 0x1ef   : > { %v523_v36 = vcombine.low %v498_v27, %v506_v28  ;;  %v524_v37 = vcombine.high %v498_v27, %v506_v28  ;;  %v539_v39 = vcombine.low %v514_v29, %v522_v30  ;;  %v540_v40 = vcombine.high %v514_v29, %v522_v30 }
 0x1f0   : > { %v770_v43 = vpack.c.bf16 %v766_v32, %v766_v32  ;;  %v771_v44 = vpack.c.bf16 %v767_v33, %v767_v33  ;;  %v772_v45 = vpack.c.bf16 %v768_v34, %v768_v34  ;;  %v773_v46 = vpack.c.bf16 %v769_v35, %v769_v35 }
 0x1f1   : > { %v531_v47 = vrot.slane %v523_v36, %v1982_v38  ;;  %v538_v48 = vrot.slane %v524_v37, %v1982_v38  ;;  %v547_v49 = vrot.slane %v539_v39, %v1982_v38  ;;  %v554_v50 = vrot.slane %v540_v40, %v1982_v38 }
 0x1f2   : > { %v844_v51 = vcombine.low %v1975_v17, %v839_v41  ;;  %v845_v52 = vcombine.high %v1975_v17, %v839_v41  ;;  %v860_v53 = vcombine.low %v2004_v13, %v842_v42  ;;  %v861_v54 = vcombine.high %v2004_v13, %v842_v42  ;;  %774 = vst.msk [vmem:[%s342_s18] sm:$0xf] %vm563_vm2, %v770_v43 }
 0x1f3   : > { %775 = vst.msk [vmem:[%s342_s18 + $0x4] sm:$0xf] %vm563_vm2, %v771_v44  ;;  %776 = vst.msk [vmem:[%s342_s18 + $0x8] sm:$0xf] %vm563_vm2, %v772_v45  ;;  %v555_v55 = vcombine.low %v531_v47, %v547_v49  ;;  %v556_v17 = vcombine.high %v531_v47, %v547_v49  ;;  %v557_v56 = vcombine.low %v538_v48, %v554_v50 }
 0x1f4   : > { %777 = vst.msk [vmem:[%s342_s18 + $0xc] sm:$0xf] %vm563_vm2, %v773_v46  ;;  %v558_v57 = vcombine.high %v538_v48, %v554_v50 }
 0x1f5   : > { %1551 = shalt.err (!%p1548_p8)
}
 0x1f6   : > { %s1552_s27 = scalar_lea.hbm %s2026_s11, 256  ;;  %s1556_s24 = scalar_lea.hbm %s2204_s5, 512 }
 0x1f7   : > { %p1553_p1 = scmp.ne.s32.totalorder %s2026_s11, %s1552_s27  ;;  %p1557_p11 = scmp.lt.u32.totalorder %s2026_s11, %s2204_s5 }
 0x1f8   : > { %p1558_p6 = scmp.lt.u32.totalorder %s1556_s24, %s1552_s27  ;;  %p1560_p5 = scmp.lt.u32.totalorder %s1552_s27, %s2026_s11 }
 0x1f9   : > { %p1554_p12 = pnand %p1553_p1, %p1901_p10 }
 0x1fa   : > { %p1559_p3 = por %p1558_p6, %p1557_p11 }
 0x1fb   : > { %p1555_p13 = pneg %p1554_p12 }
 0x1fc   : > { %p1561_p7 = por %p1560_p5, %p1559_p3 }
 0x1fe   : > { %p1562_p9 = pnand %p1561_p7, %p1555_p13 }
 0x200   : > { %1565 = shalt.err (!%p1562_p9)
}
 0x201   : > { %s1704_s15 = smov 64   ;;  %s1705_s7 = smov 4   ;;  %v852_v58 = vrot.slane %v844_v51, %v1980_v31  ;;  %v859_v59 = vrot.slane %v845_v52, %v1980_v31  ;;  %v868_v60 = vrot.slane %v860_v53, %v1980_v31  ;;  %v875_v61 = vrot.slane %v861_v54, %v1980_v31 }
 0x202   : > { %1319 = dma.vmem_to_hbm [thread:$0]  (%p1901_p10), %s2028_s30, 256, %s2026_s11, %s2048_s14, %s1704_s15, %s1704_s15, %s1705_s7   ;;  %v559_v62 = vpack.c.bf16 %v555_v55, %v555_v55  ;;  %v560_v63 = vpack.c.bf16 %v556_v17, %v556_v17  ;;  %v561_v0 = vpack.c.bf16 %v557_v56, %v557_v56  ;;  %v562_v1 = vpack.c.bf16 %v558_v57, %v558_v57 }
 0x203   : > { %s2083_s30 = scalar_lea.hbm %s2203_s4, %s2019_s12  ;;  %v876_v2 = vcombine.low %v852_v58, %v868_v60  ;;  %v877_v3 = vcombine.high %v852_v58, %v868_v60  ;;  %v892_v4 = vcombine.low %v859_v59, %v875_v61  ;;  %v893_v5 = vcombine.high %v859_v59, %v875_v61  ;;  %s989_s11 = scalar_lea.sflag [#allocation4], %s1956_s21 }
 0x204   : > { %564 = vst.msk [vmem:[%s2043_s20] sm:$0xf] %vm563_vm2, %v559_v62  ;;  %565 = vst.msk [vmem:[%s2043_s20 + $0x4] sm:$0xf] %vm563_vm2, %v560_v63  ;;  %s1566_s9 = scalar_lea.vmem %s2087_s17, 256  ;;  %s1706_s18 = smov [#allocation10]  }
 0x205   : > { %566 = vst.msk [vmem:[%s2043_s20 + $0x8] sm:$0xf] %vm563_vm2, %v561_v0  ;;  %567 = vst.msk [vmem:[%s2043_s20 + $0xc] sm:$0xf] %vm563_vm2, %v562_v1  ;;  %v884_v6 = vrot.slane %v876_v2, %v1982_v38  ;;  %v891_v7 = vrot.slane %v877_v3, %v1982_v38  ;;  %v900_v8 = vrot.slane %v892_v4, %v1982_v38  ;;  %p1567_p0 = scmp.ne.s32.totalorder %s2087_s17, %s1566_s9  ;;  %s1570_s24 = sshll.u32 %s1706_s18, 4  ;;  %s1571_s24 = int_to_ptr.vmem [resolvable:$false] %s1570_s24 }
 0x206   : > { %v907_v9 = vrot.slane %v893_v5, %v1982_v38  ;;  %s1572_s19 = scalar_lea.vmem %s1571_s24, 512  ;;  %p1573_p8 = scmp.lt.s32.totalorder %s2087_s17, %s1571_s24 }
 0x207   : > { %p1568_p2 = pnand %p1567_p0, %p1901_p10  ;;  %p1574_p1 = scmp.lt.s32.totalorder %s1572_s19, %s1566_s9 }
 0x209   : > { %p1569_p4 = pneg %p1568_p2  ;;  %p1575_p12 = por %p1574_p1, %p1573_p8 }
 0x20b   : > { %p1576_p13 = pnand %p1575_p12, %p1569_p4 }
 0x20d   : > { %1579 = shalt.err (!%p1576_p13)
}
 0x20e   : > { %s1580_s20 = scalar_lea.hbm %s2083_s30, 256  ;;  %s1584_s27 = scalar_lea.hbm %s2203_s4, 512 }
 0x20f   : > { %p1581_p11 = scmp.ne.s32.totalorder %s2083_s30, %s1580_s20  ;;  %p1585_p5 = scmp.lt.u32.totalorder %s2083_s30, %s2203_s4 }
 0x210   : > { %p1586_p7 = scmp.lt.u32.totalorder %s1584_s27, %s1580_s20  ;;  %p1588_p0 = scmp.lt.u32.totalorder %s1580_s20, %s2083_s30 }
 0x211   : > { %p1582_p6 = pnand %p1581_p11, %p1901_p10 }
 0x212   : > { %p1587_p9 = por %p1586_p7, %p1585_p5 }
 0x213   : > { %p1583_p3 = pneg %p1582_p6 }
 0x214   : > { %p1589_p2 = por %p1588_p0, %p1587_p9 }
 0x216   : > { %p1590_p4 = pnand %p1589_p2, %p1583_p3 }
 0x218   : > { %1593 = shalt.err (!%p1590_p4)
}
 0x219   : > { %1318 = dma.vmem_to_hbm [thread:$0]  (%p1901_p10), %s2087_s17, 256, %s2083_s30, %s989_s11, %s1704_s15, %s1704_s15, %s1705_s7   ;;  %v912_v10 = vcombine.low %v884_v6, %v891_v7  ;;  %v1255_v11 = vcombine.high %v884_v6, %v891_v7  ;;  %v928_v12 = vcombine.low %v900_v8, %v907_v9  ;;  %v1256_v13 = vcombine.high %v900_v8, %v907_v9 }
 0x21a   : > { %s349_s21 = scalar_lea.vmem [#allocation13], %s2007_s13  ;;  %s2141_s9 = scalar_lea.hbm %s2205_s6, %s2019_s12 }
 0x21b   : > { %v919_v14 = vrot.slane %v912_v10, %v1980_v31  ;;  %v927_v15 = vrot.slane %v1255_v11, %v1980_v31  ;;  %v935_v16 = vrot.slane %v928_v12, %v1980_v31  ;;  %v943_v18 = vrot.slane %v1256_v13, %v1980_v31  ;;  %s1047_s17 = sshll.u32 %s349_s21, 4  ;;  %s1707_s12 = smov [#allocation13]   ;;  %s2143_s17 = int_to_ptr.vmem [resolvable:$true] %s1047_s17 }
 0x21c   : > { %s1594_s13 = scalar_lea.vmem %s2143_s17, 256  ;;  %s1598_s19 = sshll.u32 %s1707_s12, 4  ;;  %s1599_s19 = int_to_ptr.vmem [resolvable:$false] %s1598_s19 }
 0x21d   : > { %v944_v19 = vcombine.low %v919_v14, %v927_v15  ;;  %v945_v20 = vcombine.high %v919_v14, %v927_v15  ;;  %v960_v21 = vcombine.low %v935_v16, %v943_v18  ;;  %v961_v22 = vcombine.high %v935_v16, %v943_v18  ;;  %p1595_p8 = scmp.ne.s32.totalorder %s2143_s17, %s1594_s13  ;;  %s1600_s20 = scalar_lea.vmem %s1599_s19, 512 }
 0x21e   : > { %p1601_p13 = scmp.lt.s32.totalorder %s2143_s17, %s1599_s19  ;;  %p1602_p11 = scmp.lt.s32.totalorder %s1600_s20, %s1594_s13 }
 0x21f   : > { %v952_v23 = vrot.slane %v944_v19, %v1982_v38  ;;  %v959_v24 = vrot.slane %v945_v20, %v1982_v38  ;;  %v968_v25 = vrot.slane %v960_v21, %v1982_v38  ;;  %v975_v26 = vrot.slane %v961_v22, %v1982_v38  ;;  %p1596_p1 = pnand %p1595_p8, %p1901_p10 }
 0x220   : > { %p1603_p6 = por %p1602_p11, %p1601_p13 }
 0x221   : > { %v976_v27 = vcombine.low %v952_v23, %v968_v25  ;;  %v977_v28 = vcombine.high %v952_v23, %v968_v25  ;;  %v978_v29 = vcombine.low %v959_v24, %v975_v26  ;;  %v979_v31 = vcombine.high %v959_v24, %v975_v26  ;;  %p1597_p12 = pneg %p1596_p1 }
 0x223   : > { %v980_v30 = vpack.c.bf16 %v976_v27, %v976_v27  ;;  %v981_v32 = vpack.c.bf16 %v977_v28, %v977_v28  ;;  %v982_v33 = vpack.c.bf16 %v978_v29, %v978_v29  ;;  %v983_v34 = vpack.c.bf16 %v979_v31, %v979_v31  ;;  %p1604_p3 = pnand %p1603_p6, %p1597_p12 }
 0x225   : > { %984 = vst.msk [vmem:[%s349_s21] sm:$0xf] %vm563_vm2, %v980_v30  ;;  %985 = vst.msk [vmem:[%s349_s21 + $0x4] sm:$0xf] %vm563_vm2, %v981_v32 }
 0x226   : > { %986 = vst.msk [vmem:[%s349_s21 + $0x8] sm:$0xf] %vm563_vm2, %v982_v33  ;;  %987 = vst.msk [vmem:[%s349_s21 + $0xc] sm:$0xf] %vm563_vm2, %v983_v34 }
 0x227   : > { %1607 = shalt.err (!%p1604_p3)
}
 0x228   : > { %s1608_s29 = scalar_lea.hbm %s2141_s9, 256  ;;  %s1612_s18 = scalar_lea.hbm %s2205_s6, 512 }
 0x229   : > { %p1609_p5 = scmp.ne.s32.totalorder %s2141_s9, %s1608_s29  ;;  %p1613_p0 = scmp.lt.u32.totalorder %s2141_s9, %s2205_s6 }
 0x22a   : > { %p1614_p2 = scmp.lt.u32.totalorder %s1612_s18, %s1608_s29  ;;  %p1616_p8 = scmp.lt.u32.totalorder %s1608_s29, %s2141_s9 }
 0x22b   : > { %p1610_p7 = pnand %p1609_p5, %p1901_p10 }
 0x22c   : > { %p1615_p4 = por %p1614_p2, %p1613_p0 }
 0x22d   : > { %p1611_p9 = pneg %p1610_p7 }
 0x22e   : > { %p1617_p1 = por %p1616_p8, %p1615_p4 }
 0x230   : > { %p1618_p12 = pnand %p1617_p1, %p1611_p9 }
 0x232   : > { %1621 = shalt.err (!%p1618_p12)
}
 0x233   : > { %1320 = dma.vmem_to_hbm [thread:$0]  (%p1901_p10), %s2143_s17, 256, %s2141_s9, %s2048_s14, %s1704_s15, %s1704_s15, %s1705_s7  }
 0x234 PF: > { %s2228_s30 = sld [smem:[#allocation19_spill]]  ;;  %s2229_s11 = sld [smem:[#allocation20_spill]] }
 0x235   : > { %p2231_p11 = scmp.ge.s32.totalorder %s1688_s26, 2 }
 0x23a   : > { %s1062_s13 = sand.u32 1, %s2228_s30   ;;  %p2230_p13 = scmp.ne.s32.totalorder %s2229_s11, 0 }
 0x23b   : > { %s1063_s12 = scalar_lea.sflag [#allocation4], %s1062_s13 }
 0x23c   : > { %p1339_p6 = pnand %p2231_p11, %p2230_p13 }
 0x23e   : > { %1659 = dma.done.wait (!%p1339_p6), %s1063_s12, 256  }
 0x23f   : > { %1661 = vsyncadd (!%p1339_p6), %s1063_s12, 4294967040  ;;  %s2232_s28 = sadd.s32 4294967294, %s1688_s26  }
 0x240   : > { %s1071_s19 = sand.u32 1, %s2232_s28  }
 0x241   : > { %s1072_s20 = scalar_lea.sflag [#allocation12], %s1071_s19 }
 0x242   : > { %1663 = dma.done.wait (!%p1339_p6), %s1072_s20, 512  }
 0x243   : > { %1665 = vsyncadd (!%p1339_p6), %s1072_s20, 4294966784  ;;  %s28_s26 = sadd.s32 1, %s1688_s26   ;;  %s2233_s21 = smov %s1672_s22 }
 0x244   : > { %p25_p10 = scmp.ge.s32.totalorder %s28_s26, 4   ;;  %s2234_s22 = smov %s1676_s23 }
 0x245   : > { %s2235_s23 = smov %s1913_s16  ;;  %s2236_s24 = smov %s1684_s25 }
 0x246   : > { %s2237_s25 = smov %s2239_s10  ;;  %27 = sbr.rel (!%p25_p10) target bundleno = 10 (0xa), region = 125 }
 0x24d   :  { %1086 = vsyncpa [#allocation3], 1 }
 0x24e   :  { %1088 = vsyncpa [#allocation3 + $0x1], 1 }
 0x24f   :  { %1089 = vsyncpa [#allocation6], 1 }
 0x250   :  { %1090 = vsyncpa [#allocation9], 1 }
 0x251   :  { %1091 = vsyncpa [#allocation4], 1 }
 0x252   :  { %1093 = vsyncpa [#allocation4 + $0x1], 1 }
 0x253   :  { %1094 = vsyncpa [#allocation12], 1 }
 0x254   :  { %1096 = vsyncpa [#allocation12 + $0x1], 1 }

</bundles_post_ra>
